<compile_context>
chip_gen: v7x
topology: tpu7x:2x2x1
jax: 0.10.0
libtpu: 0.0.40
codegen_flags: <defaults>
</compile_context>

<pallas_src>
import functools

import jax
import jax.numpy as jnp
from jax import lax
from jax.experimental import pallas as pl
from jax.experimental.pallas import tpu as pltpu


def _round_up(x, m):
    return ((x + m - 1) // m) * m


def _conv1d_kernel(x_ref, hl_ref, hr_ref, w_ref, b_ref, o_ref, lhs_ref, *,
                   kernel_size, stride, padding, dilation, c_in, tl, halo,
                   length, row_chunk, activation):
    """One (batch b, row-tile t, C_out-tile co) grid step.

    x_ref  : (1, TL, CF)    main folded-input tile        (CF = stride * C_in)
    hl_ref : (1, H, CF)     halo rows just before the tile (left conv padding)
    hr_ref : (1, H, CF)     halo rows just after the tile
    w_ref  : (K*C_in, TCO)  im2col weights for this C_out tile
    b_ref  : (1, TCO)       bias for this C_out tile
    o_ref  : (1, TL, TCO)   output tile (lane-dense)
    lhs_ref: (TL, K*C_in)   VMEM scratch holding the im2col LHS
    """
    t = pl.program_id(1)

    # Build the im2col LHS once per (b, t); reused across every C_out tile.
    @pl.when(pl.program_id(2) == 0)
    def _build_lhs():
        for k in range(kernel_size):
            off = k * dilation - padding            # signed, original coords
            q, ph = off // stride, off % stride     # folded row offset / phase
            sc = slice(ph * c_in, (ph + 1) * c_in)
            if q < 0:
                left = hl_ref[0, halo + q:halo, sc]
                piece = (left if tl + q == 0 else
                         jnp.concatenate([left, x_ref[0, 0:tl + q, sc]], axis=0))
            elif q == 0:
                piece = x_ref[0, :, sc]
            else:
                right = hr_ref[0, 0:q, sc]
                piece = (right if tl - q == 0 else
                         jnp.concatenate([x_ref[0, q:tl, sc], right], axis=0))
            # Zero every row whose original input index falls outside [0, L):
            # implements the conv zero-padding and neutralizes clamped /
            # out-of-bounds halo reads at the sequence edges.
            j = lax.broadcasted_iota(jnp.int32, (tl, c_in), 0)
            g = (t * tl + j) * stride + off
            valid = (g >= 0) & (g < length)
            lhs_ref[:, k * c_in:(k + 1) * c_in] = jnp.where(valid, piece, 0.0)

    # Single fused matmul over the K*C_in contraction, processed in row chunks
    # so the f32 result stays small instead of a big register-resident value.
    for r0 in range(0, tl, row_chunk):
        rc = min(row_chunk, tl - r0)
        y = jnp.dot(lhs_ref[r0:r0 + rc, :], w_ref[...],
                    preferred_element_type=jnp.float32)
        y = y + b_ref[...]
        y = jnp.maximum(y, 0.0) if activation == "relu" else jnp.tanh(y)
        o_ref[0, r0:r0 + rc, :] = y.astype(o_ref.dtype)


def conv1d(x, weight, bias, *, stride=1, padding=0, dilation=1,
           activation="relu", tile_rows=None):
    """Channels-last Conv1d + activation (nn.Conv1d semantics, groups=1).

    x: (B, L, C_in); weight: (K, C_in, C_out); bias: (C_out,).
    Returns (B, L_out, C_out).
    """
    # TODO(synk): groups != 1 is not implemented (fastNLP default is groups=1).
    assert activation in ("relu", "tanh")
    B, L, C_in = x.shape
    K, _, C_out = weight.shape
    itemsize = jnp.dtype(x.dtype).itemsize
    L_out = (L + 2 * padding - dilation * (K - 1) - 1) // stride + 1
    assert L_out >= 1, "output length must be positive"

    # ---- fold the stride into the channel dim (free reshape when s | L) ----
    if stride == 1:
        x_f, CF, Lf = x, C_in, L
    else:
        Lp = _round_up(L, stride)
        if Lp != L:
            # TODO(synk): tiny right-pad copy only when L % stride != 0; the
            # conv's own left/right zero padding is handled fully in-kernel.
            x = jnp.pad(x, ((0, 0), (0, Lp - L), (0, 0)))
        CF, Lf = stride * C_in, Lp // stride
        x_f = x.reshape(B, Lf, CF)

    KC = K * C_in

    # ---- output-channel tiling (lane-dense stores; 256 fills v6e/v7x MXU) ---
    TCO = 256 if _round_up(C_out, 128) >= 256 else 128
    C_out_p = _round_up(C_out, TCO)
    num_co = C_out_p // TCO

    # ---- halo size: left needs ceil(p/s) rows, right needs the max tap offset
    hl_need = -((-padding) // stride)
    hr_need = max((dilation * (K - 1) - padding) // stride, 0)
    H = _round_up(max(hl_need, hr_need, 1), 8)

    # ---- row-tile size from the VMEM budget (generation aware) -------------
    try:
        vmem_cap = int(getattr(pltpu.get_tpu_info(), "vmem_capacity_bytes",
                               64 << 20))
    except Exception:  # conservative fallback (v7x-sized VMEM)
        vmem_cap = 64 << 20
    budget = min(vmem_cap // 2, 48 << 20)

    CFp = _round_up(CF, 128)              # physical lane padding of input tiles
    KCp = _round_up(KC, 128)              # physical lane padding of the scratch
    row_bytes = (2 * CFp + 2 * TCO + KCp) * itemsize            # per TL row
    fixed_bytes = (4 * H * CFp + 2 * _round_up(KC, 8) * TCO + 2 * TCO) * itemsize
    tl_budget = max(((budget - fixed_bytes) // row_bytes) // H * H, H)
    tl_target = _round_up(tile_rows if tile_rows else 512, H)
    TL = max(min(_round_up(L_out, H), tl_target, tl_budget), H)
    num_t = pl.cdiv(L_out, TL)
    row_chunk = max(8, (16384 // TCO) // 8 * 8)   # f32 result chunk <= ~64 KiB

    # ---- wrapper-side weight/bias prep (one-time, tiny) --------------------
    w2 = jnp.pad(weight.reshape(KC, C_out), ((0, 0), (0, C_out_p - C_out)))
    b2 = jnp.pad(bias, (0, C_out_p - C_out)).reshape(1, C_out_p)

    rat = TL // H
    mt_main = max(pl.cdiv(Lf, TL) - 1, 0)
    mt_halo = max(pl.cdiv(Lf, H) - 1, 0)

    def main_map(b, t, co, _mt=mt_main):
        return (b, jnp.minimum(t, _mt), 0)

    def left_map(b, t, co, _r=rat, _mt=mt_halo):
        return (b, jnp.minimum(jnp.maximum(t * _r - 1, 0), _mt), 0)

    def right_map(b, t, co, _r=rat, _mt=mt_halo):
        return (b, jnp.minimum((t + 1) * _r, _mt), 0)

    kernel = functools.partial(
        _conv1d_kernel, kernel_size=K, stride=stride, padding=padding,
        dilation=dilation, c_in=C_in, tl=TL, halo=H, length=L,
        row_chunk=row_chunk, activation=activation)

    out = pl.pallas_call(
        kernel,
        out_shape=jax.ShapeDtypeStruct((B, L_out, C_out_p), x.dtype),
        grid_spec=pltpu.PrefetchScalarGridSpec(
            num_scalar_prefetch=0,
            grid=(B, num_t, num_co),
            in_specs=[
                pl.BlockSpec((1, TL, CF), main_map),    # main tile
                pl.BlockSpec((1, H, CF), left_map),     # left halo
                pl.BlockSpec((1, H, CF), right_map),    # right halo
                pl.BlockSpec((KC, TCO), lambda b, t, co: (0, co)),
                pl.BlockSpec((1, TCO), lambda b, t, co: (0, co)),
            ],
            out_specs=pl.BlockSpec((1, TL, TCO), lambda b, t, co: (b, t, co)),
            scratch_shapes=[pltpu.VMEM((TL, KC), x.dtype)],
        ),
        compiler_params=pltpu.CompilerParams(
            dimension_semantics=("parallel", "parallel", "arbitrary"),
            vmem_limit_bytes=int(min(vmem_cap * 3 // 4, 100 << 20))),
    )(x_f, x_f, x_f, w2, b2)

    return out if C_out == C_out_p else out[..., :C_out]


def make_conv_params(key, in_channels, out_channels, kernel_size):
    """Deterministic xavier_uniform-style init (shapes match nn.Conv1d)."""
    kw, kb = jax.random.split(key)
    fan_in = in_channels * kernel_size
    fan_out = out_channels * kernel_size
    bound = (6.0 / (fan_in + fan_out)) ** 0.5
    w_torch = jax.random.uniform(kw, (out_channels, in_channels, kernel_size),
                                 jnp.float32, -bound, bound)
    weight = jnp.transpose(w_torch, (2, 1, 0))          # (K, C_in, C_out)
    b_bound = 1.0 / (fan_in ** 0.5)
    bias = jax.random.uniform(kb, (out_channels,), jnp.float32,
                              -b_bound, b_bound)
    return weight, bias


def _reference(x, weight, bias, stride, padding, dilation, activation):
    """Plain-JAX conv matching PyTorch Conv1d + activation semantics."""
    x_ncw = jnp.transpose(x, (0, 2, 1))                  # (B, C_in, L)
    w_oik = jnp.transpose(weight, (2, 1, 0))             # (C_out, C_in, K)
    y = lax.conv_general_dilated(
        x_ncw, w_oik, window_strides=(stride,), padding=[(padding, padding)],
        rhs_dilation=(dilation,), dimension_numbers=("NCH", "OIH", "NCH"))
    y = y + bias[None, :, None]
    y = jnp.maximum(y, 0.0) if activation == "relu" else jnp.tanh(y)
    return jnp.transpose(y, (0, 2, 1))                   # (B, L_out, C_out)


if __name__ == "__main__":
    key = jax.random.PRNGKey(0)
    configs = [
        # primary small demo shape (module defaults: stride=1)
        dict(B=2, L=8, C_in=4, C_out=6, K=3, stride=1, padding=1, dilation=1,
             activation="relu"),
        # multi-tile path with a ragged last tile (halo blocks + edge masking)
        dict(B=2, L=50, C_in=4, C_out=6, K=3, stride=1, padding=1, dilation=1,
             activation="relu", tile_rows=16),
        # dilation > 1 with full-width halos on both sides
        dict(B=1, L=16, C_in=4, C_out=6, K=5, stride=1, padding=4, dilation=2,
             activation="relu"),
        # stride > 1 exercises the stride-folding / channel-phase path
        dict(B=2, L=20, C_in=3, C_out=10, K=3, stride=2, padding=1, dilation=1,
             activation="relu"),
        # stride > 1 + dilation > 1 + odd length + tanh + multi-tile
        dict(B=1, L=21, C_in=4, C_out=6, K=3, stride=2, padding=2, dilation=2,
             activation="tanh", tile_rows=8),
        # C_out > 128: 256-wide output tiles, num_co > 1 (co "arbitrary" sweep)
        dict(B=2, L=40, C_in=8, C_out=300, K=3, stride=1, padding=1, dilation=1,
             activation="relu"),
    ]

    for cfg in configs:
        key, kx, kp = jax.random.split(key, 3)
        x = jax.random.normal(kx, (cfg["B"], cfg["L"], cfg["C_in"]),
                              jnp.float32)                # (batch, seq, ch)
        weight, bias = make_conv_params(kp, cfg["C_in"], cfg["C_out"], cfg["K"])

        out = conv1d(x, weight, bias, stride=cfg["stride"],
                     padding=cfg["padding"], dilation=cfg["dilation"],
                     activation=cfg["activation"],
                     tile_rows=cfg.get("tile_rows"))
        out = jax.block_until_ready(out)

        ref = _reference(x, weight, bias, cfg["stride"], cfg["padding"],
                         cfg["dilation"], cfg["activation"])
        assert out.shape == ref.shape, (cfg, out.shape, ref.shape)
        assert jnp.allclose(out, ref, atol=1e-5, rtol=1e-5), cfg

    print("KERNEL_OK")
</pallas_src>

<mosaic_0001>
module attributes {stable_mosaic.version = 11 : i64} {
  func.func @_conv1d_kernel(%arg0: i32, %arg1: i32, %arg2: i32, %arg3: memref<1x8x4xf32, #tpu.memory_space<vmem>>, %arg4: memref<1x8x4xf32, #tpu.memory_space<vmem>>, %arg5: memref<1x8x4xf32, #tpu.memory_space<vmem>>, %arg6: memref<12x128xf32, #tpu.memory_space<vmem>>, %arg7: memref<1x128xf32, #tpu.memory_space<vmem>>, %arg8: memref<1x8x128xf32, #tpu.memory_space<vmem>>, %arg9: memref<8x12xf32, #tpu.memory_space<vmem>>) attributes {dimension_semantics = [#tpu.dimension_semantics<parallel>, #tpu.dimension_semantics<parallel>, #tpu.dimension_semantics<arbitrary>], iteration_bounds = array<i64: 2, 1, 1>, scalar_prefetch = 0 : i64, scratch_operands = 1 : i64, tpu.core_type = #tpu.core_type<tc>, window_params = [{transform_indices = @transform_0, window_bounds = array<i64: 1, 8, 4>}, {transform_indices = @transform_1, window_bounds = array<i64: 1, 8, 4>}, {transform_indices = @transform_2, window_bounds = array<i64: 1, 8, 4>}, {transform_indices = @transform_3, window_bounds = array<i64: 12, 128>}, {transform_indices = @transform_4, window_bounds = array<i64: 1, 128>}, {transform_indices = @transform_5, window_bounds = array<i64: 1, 8, 128>}]} {
    %c0_i32 = arith.constant 0 : i32
    %0 = arith.cmpi eq, %arg2, %c0_i32 : i32
    %1 = arith.extui %0 : i1 to i32
    %c0_i32_0 = arith.constant 0 : i32
    %2 = arith.cmpi ne, %1, %c0_i32_0 : i32
    scf.if %2 {
      %c0_10 = arith.constant 0 : index
      %c7 = arith.constant 7 : index
      %c0_11 = arith.constant 0 : index
      %14 = vector.load %arg4[%c0_10, %c7, %c0_11] : memref<1x8x4xf32, #tpu.memory_space<vmem>>, vector<1x1x4xf32>
      %15 = vector.shape_cast %14 : vector<1x1x4xf32> to vector<1x4xf32>
      %c0_12 = arith.constant 0 : index
      %c0_13 = arith.constant 0 : index
      %c0_14 = arith.constant 0 : index
      %16 = vector.load %arg3[%c0_12, %c0_13, %c0_14] : memref<1x8x4xf32, #tpu.memory_space<vmem>>, vector<1x7x4xf32>
      %17 = vector.shape_cast %16 : vector<1x7x4xf32> to vector<7x4xf32>
      %18 = tpu.concatenate %15, %17 in 0 : vector<1x4xf32>, vector<7x4xf32> -> vector<8x4xf32>
      %19 = tpu.iota {dimensions = array<i32: 0>} : vector<8x4xi32>
      %c8_i32 = arith.constant 8 : i32
      %20 = arith.muli %arg1, %c8_i32 : i32
      %21 = vector.broadcast %20 : i32 to vector<8x4xi32>
      %22 = arith.addi %21, %19 : vector<8x4xi32>
      %c1_i32 = arith.constant 1 : i32
      %23 = vector.broadcast %c1_i32 : i32 to vector<8x4xi32>
      %24 = arith.muli %22, %23 : vector<8x4xi32>
      %c-1_i32 = arith.constant -1 : i32
      %25 = vector.broadcast %c-1_i32 : i32 to vector<8x4xi32>
      %26 = arith.addi %24, %25 : vector<8x4xi32>
      %c0_i32_15 = arith.constant 0 : i32
      %27 = vector.broadcast %c0_i32_15 : i32 to vector<8x4xi32>
      %28 = arith.cmpi sge, %26, %27 : vector<8x4xi32>
      %c8_i32_16 = arith.constant 8 : i32
      %29 = vector.broadcast %c8_i32_16 : i32 to vector<8x4xi32>
      %30 = arith.cmpi slt, %26, %29 : vector<8x4xi32>
      %31 = arith.andi %28, %30 : vector<8x4xi1>
      %cst_17 = arith.constant 0.000000e+00 : f32
      %32 = vector.broadcast %cst_17 : f32 to vector<8x4xf32>
      %33 = arith.select %31, %18, %32 : vector<8x4xi1>, vector<8x4xf32>
      %c0_18 = arith.constant 0 : index
      %c0_19 = arith.constant 0 : index
      %34 = vector.load %arg9[%c0_18, %c0_19] : memref<8x12xf32, #tpu.memory_space<vmem>>, vector<8x4xf32>
      tpu.vector_store %arg9[%c0_18, %c0_19], %33 {strides = array<i32>} : memref<8x12xf32, #tpu.memory_space<vmem>>, vector<8x4xf32>,
      %c0_20 = arith.constant 0 : index
      %c0_21 = arith.constant 0 : index
      %c0_22 = arith.constant 0 : index
      %35 = vector.load %arg3[%c0_20, %c0_21, %c0_22] : memref<1x8x4xf32, #tpu.memory_space<vmem>>, vector<1x8x4xf32>
      %36 = vector.shape_cast %35 : vector<1x8x4xf32> to vector<8x4xf32>
      %37 = tpu.iota {dimensions = array<i32: 0>} : vector<8x4xi32>
      %c8_i32_23 = arith.constant 8 : i32
      %38 = arith.muli %arg1, %c8_i32_23 : i32
      %39 = vector.broadcast %38 : i32 to vector<8x4xi32>
      %40 = arith.addi %39, %37 : vector<8x4xi32>
      %c1_i32_24 = arith.constant 1 : i32
      %41 = vector.broadcast %c1_i32_24 : i32 to vector<8x4xi32>
      %42 = arith.muli %40, %41 : vector<8x4xi32>
      %c0_i32_25 = arith.constant 0 : i32
      %43 = vector.broadcast %c0_i32_25 : i32 to vector<8x4xi32>
      %44 = arith.addi %42, %43 : vector<8x4xi32>
      %c0_i32_26 = arith.constant 0 : i32
      %45 = vector.broadcast %c0_i32_26 : i32 to vector<8x4xi32>
      %46 = arith.cmpi sge, %44, %45 : vector<8x4xi32>
      %c8_i32_27 = arith.constant 8 : i32
      %47 = vector.broadcast %c8_i32_27 : i32 to vector<8x4xi32>
      %48 = arith.cmpi slt, %44, %47 : vector<8x4xi32>
      %49 = arith.andi %46, %48 : vector<8x4xi1>
      %cst_28 = arith.constant 0.000000e+00 : f32
      %50 = vector.broadcast %cst_28 : f32 to vector<8x4xf32>
      %51 = arith.select %49, %36, %50 : vector<8x4xi1>, vector<8x4xf32>
      %c0_29 = arith.constant 0 : index
      %c4 = arith.constant 4 : index
      %52 = vector.load %arg9[%c0_29, %c4] : memref<8x12xf32, #tpu.memory_space<vmem>>, vector<8x4xf32>
      tpu.vector_store %arg9[%c0_29, %c4], %51 {strides = array<i32>} : memref<8x12xf32, #tpu.memory_space<vmem>>, vector<8x4xf32>,
      %c0_30 = arith.constant 0 : index
      %c0_31 = arith.constant 0 : index
      %c0_32 = arith.constant 0 : index
      %53 = vector.load %arg5[%c0_30, %c0_31, %c0_32] : memref<1x8x4xf32, #tpu.memory_space<vmem>>, vector<1x1x4xf32>
      %54 = vector.shape_cast %53 : vector<1x1x4xf32> to vector<1x4xf32>
      %c0_33 = arith.constant 0 : index
      %c1 = arith.constant 1 : index
      %c0_34 = arith.constant 0 : index
      %55 = vector.load %arg3[%c0_33, %c1, %c0_34] : memref<1x8x4xf32, #tpu.memory_space<vmem>>, vector<1x7x4xf32>
      %56 = vector.shape_cast %55 : vector<1x7x4xf32> to vector<7x4xf32>
      %57 = tpu.concatenate %56, %54 in 0 : vector<7x4xf32>, vector<1x4xf32> -> vector<8x4xf32>
      %58 = tpu.iota {dimensions = array<i32: 0>} : vector<8x4xi32>
      %c8_i32_35 = arith.constant 8 : i32
      %59 = arith.muli %arg1, %c8_i32_35 : i32
      %60 = vector.broadcast %59 : i32 to vector<8x4xi32>
      %61 = arith.addi %60, %58 : vector<8x4xi32>
      %c1_i32_36 = arith.constant 1 : i32
      %62 = vector.broadcast %c1_i32_36 : i32 to vector<8x4xi32>
      %63 = arith.muli %61, %62 : vector<8x4xi32>
      %c1_i32_37 = arith.constant 1 : i32
      %64 = vector.broadcast %c1_i32_37 : i32 to vector<8x4xi32>
      %65 = arith.addi %63, %64 : vector<8x4xi32>
      %c0_i32_38 = arith.constant 0 : i32
      %66 = vector.broadcast %c0_i32_38 : i32 to vector<8x4xi32>
      %67 = arith.cmpi sge, %65, %66 : vector<8x4xi32>
      %c8_i32_39 = arith.constant 8 : i32
      %68 = vector.broadcast %c8_i32_39 : i32 to vector<8x4xi32>
      %69 = arith.cmpi slt, %65, %68 : vector<8x4xi32>
      %70 = arith.andi %67, %69 : vector<8x4xi1>
      %cst_40 = arith.constant 0.000000e+00 : f32
      %71 = vector.broadcast %cst_40 : f32 to vector<8x4xf32>
      %72 = arith.select %70, %57, %71 : vector<8x4xi1>, vector<8x4xf32>
      %c0_41 = arith.constant 0 : index
      %c8 = arith.constant 8 : index
      %73 = vector.load %arg9[%c0_41, %c8] : memref<8x12xf32, #tpu.memory_space<vmem>>, vector<8x4xf32>
      tpu.vector_store %arg9[%c0_41, %c8], %72 {strides = array<i32>} : memref<8x12xf32, #tpu.memory_space<vmem>>, vector<8x4xf32>,
    } else {
    }
    %c0 = arith.constant 0 : index
    %c0_1 = arith.constant 0 : index
    %3 = vector.load %arg9[%c0, %c0_1] : memref<8x12xf32, #tpu.memory_space<vmem>>, vector<8x12xf32>
    %c0_2 = arith.constant 0 : index
    %c0_3 = arith.constant 0 : index
    %4 = vector.load %arg6[%c0_2, %c0_3] : memref<12x128xf32, #tpu.memory_space<vmem>>, vector<12x128xf32>
    %cst = arith.constant dense<0.000000e+00> : vector<8x128xf32>
    %5 = tpu.matmul %3, %4, %cst {dimension_numbers = #tpu.dot_dimension_numbers<[1], [0], [0], [1], [0, 0, 1, 1], [], []>} : vector<8x12xf32>, vector<12x128xf32>, vector<8x128xf32> -> vector<8x128xf32>
    %c0_4 = arith.constant 0 : index
    %c0_5 = arith.constant 0 : index
    %6 = vector.load %arg7[%c0_4, %c0_5] : memref<1x128xf32, #tpu.memory_space<vmem>>, vector<1x128xf32>
    %7 = vector.broadcast %6 : vector<1x128xf32> to vector<8x128xf32>
    %8 = arith.addf %5, %7 : vector<8x128xf32>
    %cst_6 = arith.constant 0.000000e+00 : f32
    %9 = vector.broadcast %cst_6 : f32 to vector<8x128xf32>
    %10 = arith.maximumf %8, %9 : vector<8x128xf32>
    %c0_7 = arith.constant 0 : index
    %c0_8 = arith.constant 0 : index
    %c0_9 = arith.constant 0 : index
    %11 = vector.load %arg8[%c0_7, %c0_8, %c0_9] : memref<1x8x128xf32, #tpu.memory_space<vmem>>, vector<1x8x128xf32>
    %12 = vector.shape_cast %11 : vector<1x8x128xf32> to vector<8x128xf32>
    %13 = vector.shape_cast %10 : vector<8x128xf32> to vector<1x8x128xf32>
    tpu.vector_store %arg8[%c0_7, %c0_8, %c0_9], %13 {strides = array<i32>} : memref<1x8x128xf32, #tpu.memory_space<vmem>>, vector<1x8x128xf32>,
    return
  }
  func.func @transform_0(%arg0: i32, %arg1: i32, %arg2: i32) -> (i32, i32, i32) {
    %c0_i32 = arith.constant 0 : i32
    %0 = arith.minsi %arg1, %c0_i32 : i32
    %c0_i32_0 = arith.constant 0 : i32
    %c0_i32_1 = arith.constant 0 : i32
    return %arg0, %0, %c0_i32_0 : i32, i32, i32
  }
  func.func @transform_1(%arg0: i32, %arg1: i32, %arg2: i32) -> (i32, i32, i32) {
    %c1_i32 = arith.constant 1 : i32
    %0 = arith.muli %arg1, %c1_i32 : i32
    %c1_i32_0 = arith.constant 1 : i32
    %1 = arith.subi %0, %c1_i32_0 : i32
    %c0_i32 = arith.constant 0 : i32
    %2 = arith.maxsi %1, %c0_i32 : i32
    %c0_i32_1 = arith.constant 0 : i32
    %3 = arith.minsi %2, %c0_i32_1 : i32
    %c0_i32_2 = arith.constant 0 : i32
    %c0_i32_3 = arith.constant 0 : i32
    return %arg0, %3, %c0_i32_2 : i32, i32, i32
  }
  func.func @transform_2(%arg0: i32, %arg1: i32, %arg2: i32) -> (i32, i32, i32) {
    %c1_i32 = arith.constant 1 : i32
    %0 = arith.addi %arg1, %c1_i32 : i32
    %c1_i32_0 = arith.constant 1 : i32
    %1 = arith.muli %0, %c1_i32_0 : i32
    %c0_i32 = arith.constant 0 : i32
    %2 = arith.minsi %1, %c0_i32 : i32
    %c0_i32_1 = arith.constant 0 : i32
    %c0_i32_2 = arith.constant 0 : i32
    return %arg0, %2, %c0_i32_1 : i32, i32, i32
  }
  func.func @transform_3(%arg0: i32, %arg1: i32, %arg2: i32) -> (i32, i32) {
    %c0_i32 = arith.constant 0 : i32
    %c0_i32_0 = arith.constant 0 : i32
    return %c0_i32, %arg2 : i32, i32
  }
  func.func @transform_4(%arg0: i32, %arg1: i32, %arg2: i32) -> (i32, i32) {
    %c0_i32 = arith.constant 0 : i32
    %c0_i32_0 = arith.constant 0 : i32
    return %c0_i32, %arg2 : i32, i32
  }
  func.func @transform_5(%arg0: i32, %arg1: i32, %arg2: i32) -> (i32, i32, i32) {
    %c0_i32 = arith.constant 0 : i32
    return %arg0, %arg1, %arg2 : i32, i32, i32
  }
}

</mosaic_0001>

<bundles_post_ra>
// kernel: tpu_custom_call.1
= control target key start
LH: loop header
LB: loop body
LE: loop exit
PB: predicated region body
PF: predicated region fallthrough
CT: control target
= control target key end

     0   :  { %10 = vsyncpa [#allocation4], 0  ;;  %s1039_s0 = inlined_call_operand.vmem [shape: f32[2,8,4], index: 0, kind: input, shape index: {}]   ;;  %s1040_s1 = inlined_call_operand.vmem [shape: f32[2,8,4], index: 1, kind: input, shape index: {}]   ;;  %s1041_s2 = inlined_call_operand.vmem [shape: f32[2,8,4], index: 2, kind: input, shape index: {}]   ;;  %s1042_s3 = inlined_call_operand.vmem [shape: f32[12,128], index: 3, kind: input, shape index: {}]   ;;  %s1043_s4 = inlined_call_operand.vmem [shape: f32[1,128], index: 4, kind: input, shape index: {}]   ;;  %s1044_s5 = inlined_call_operand.hbm [shape: f32[2,8,128], index: 5, kind: output, shape index: {}]  }
   0x1   :  { %12 = vsyncpa [#allocation4 + $0x1], 0  ;;  %s911_s18 = smov 0   ;;  %s913_s19 = smov 0  }
   0x2   :  { %s915_s20 = smov 0   ;;  %s917_s21 = smov 0  }
   0x3   :  { %s919_s22 = smov 0   ;;  %s921_s23 = smov 0  }
   0x4 LB: > { %s701_s24 = sadd.s32 4294967295, %s872_s23   ;;  %s702_s25 = sadd.s32 4294967294, %s872_s23   ;;  %s872_s23 = sphi %s921_s23, %s18_s23   ;;  %s868_s22 = sphi %s919_s22, %s1051_s22   ;;  %s864_s21 = sphi %s917_s21, %s1050_s21   ;;  %s860_s20 = sphi %s915_s20, %s1049_s20   ;;  %s856_s19 = sphi %s913_s19, %s1048_s19   ;;  %s852_s18 = sphi %s911_s18, %s1047_s18  }
   0x5   : > { %s37_s26 = sadd.s32 1, %s868_s22  ;;  %s204_s27 = sadd.s32 1, %s860_s20 }
   0x6   : > { %p39_p0 = scmp.ge.s32.totalorder %s37_s26, 2  ;;  %p214_p1 = scmp.ne.s32.totalorder %s860_s20, %s856_s19 }
   0x7   : > { %p215_p2 = scmp.eq.s32.totalorder %s701_s24, 1  ;;  %p220_p3 = scmp.ne.s32.totalorder %s856_s19, %s852_s18 }
   0x8   : > { %s1053_s26 = smov (%p39_p0, %s37_s26), 0  ;;  %p221_p5 = scmp.eq.s32.totalorder %s702_s25, 1 }
   0x9   : > { %p951_p4 = por %p215_p2, %p214_p1  ;;  %s197_s29 = ssub.s32 %s868_s22, %s1053_s26 }
   0xa   : > { %p707_p6 = scmp.ge.s32.totalorder %s872_s23, 1  ;;  %p202_p7 = scmp.eq.s32.totalorder %s197_s29, 0 }
   0xb   : > { %p958_p8 = por %p221_p5, %p220_p3  ;;  %p302_p9 = scmp.lt.s32.totalorder %s872_s23, 3 }
   0xc   : > { %s964_s6 = scalar_select %p202_p7, %s860_s20, %s204_s27  }
   0xd   : > { %p303_p10 = pnand %p707_p6, %p302_p9 }
   0xe   : > { %p365_p11 = scmp.lt.s32.totalorder (!%p303_p10), %s864_s21, 1  ;;  %v422_v0 = vlaneseq (!%p303_p10)  ;;  %v464_v1 = vld [vmem:[%s1042_s3] sm:$0xff] (!%p303_p10)  ;;  %v465_v2 = vld [vmem:[%s1042_s3 + $0x8] sm:$0xf] (!%p303_p10)  ;;  %v874_v4 = vmov (!%p303_p10), 0.0|0.0   ;;  %vm477_vm0 = vcmask (!%p303_p10), 1043456  }
   0xf   : > { %306 = sbr.rel (%p303_p10) target bundleno = 386 (0x182), region = 40  ;;  %729 = vmatprep.subr.bf16.mxu0 (!%p303_p10), %v874_v4  ;;  %v730_v5 = vpack.c.bf16 (!%p303_p10), %v465_v2, %v464_v1  ;;  %vm875_vm1 = vmmov (!%p303_p10), 1   ;;  %vm876_vm3 = vmmov (!%p303_p10), 0   ;;  %v877_v8 = vmov (!%p303_p10), 0.0   ;;  %s878_s7 = smov (!%p303_p10), 4  }
  0x10   : > { %v423_v3 = vshrl.u32 (!%p303_p10), %v422_v0, 7  ;;  %vm731_vm2 = vmpackc.low (!%p303_p10), %vm477_vm0, %vm875_vm1  ;;  %726 = vmatprep.mubr.msk.f32.mxu0 (!%p303_p10), %vm876_vm3, %v877_v8  ;;  %vm450_vm4 = vcmask (!%p303_p10), 1046528   ;;  %vm420_vm5 = vcmask (!%p303_p10), 1040384   ;;  %vm432_vm8 = vcmask (!%p303_p10), 31744   ;;  %s879_s8 = smov (!%p303_p10), 8   ;;  %s360_s9 = sand.u32 (!%p303_p10), 1, %s856_s19  }
  0x11   : > { %732 = vmatpush3.bf16.msk.msra.mxu0 (!%p303_p10), %vm731_vm2, %v730_v5  ;;  %vm443_vm9 = vcmask (!%p303_p10), 64544   ;;  %vm461_vm10 = vcmask (!%p303_p10), 97344   ;;  %vm473_vm11 = vcmask (!%p303_p10), 97280   ;;  %s708_s10 = sshll.u32 (!%p303_p10), %s360_s9, 3  ;;  %v712_v23 = vld [vmem:[%s1043_s4] ss:$0 sm:$0xff] (!%p303_p10) }
  0x12   : > { %v452_v6 = vadd.s32 (!%p303_p10), 1, %v423_v3  ;;  %v427_v7 = vadd.s32 (!%p303_p10), 4294967295, %v423_v3  ;;  %s716_s13 = sshll.u32 (!%p303_p10), %s864_s21, 7  ;;  %s362_s14 = scalar_lea.vmem (!%p303_p10), [#allocation3], %s708_s10 }
  0x13   : > { %s554_s25 = scalar_lea.sflag (!%p303_p10), [#allocation4], %s360_s9 }
  0x14   : > { %vm428_vm6 = vcmp.ge.s32.totalorder (!%p303_p10), %v427_v7, 0  ;;  %vm454_vm7 = vcmp.lt.s32.totalorder (!%p303_p10), %v452_v6, 8 }
  0x16   : > { %s366_s11 = scalar_select %p365_p11, %s864_s21, 1 }
  0x17   : > { %s880_s21 = smov [#allocation3]  }
  0x18   : > { %s709_s12 = sshll.u32 %s366_s11, 3 }
  0x19   : > { %s371_s15 = scalar_lea.vmem %s1039_s0, %s709_s12  ;;  %s385_s24 = scalar_lea.vmem %s1040_s1, %s709_s12 }
  0x1a   : > { %s400_s29 = scalar_lea.vmem %s1041_s2, %s709_s12  ;;  %v415_v9 = vld [vmem:[%s385_s24 + $0x7] sm:$0x1]  ;;  %v416_v11 = vld [vmem:[%s371_s15] sm:$0x7f]  ;;  %s992_s24 = scalar_lea.hbm %s1044_s5, %s716_s13 }
  0x1b   : > { %v434_v10 = vld [vmem:[%s371_s15] sm:$0xff]  ;;  %v418_v12 = vrot.slane %v416_v11, 7 }
  0x1c   : > { %440 = vrot.lane.b32.xlu0 %v434_v10, %s878_s7  ;;  %v445_v13 = vld [vmem:[%s400_s29] sm:$0x1]  ;;  %v446_v14 = vld [vmem:[%s371_s15 + $0x1] sm:$0x7f]  ;;  %s569_s15 = sshll.u32 %s362_s14, 4  ;;  %s798_s29 = sshll.u32 %s880_s21, 4  ;;  %s994_s15 = int_to_ptr.vmem [resolvable:$true] %s569_s15  ;;  %s799_s29 = int_to_ptr.vmem [resolvable:$false] %s798_s29 }
  0x1d   : > { %v448_v15 = vrot.slane %v445_v13, 1  ;;  %v421_v16 = vsel %vm420_vm5, %v415_v9, %v418_v12  ;;  %s794_s27 = scalar_lea.vmem %s994_s15, 128  ;;  %s800_s7 = scalar_lea.vmem %s799_s29, 256 }
  0x1e   : > { %v431_v18 = vsel %vm428_vm6, %v421_v16, 0.0  ;;  %p795_p12 = scmp.ne.s32.totalorder %s994_s15, %s794_s27  ;;  %p801_p1 = scmp.lt.s32.totalorder %s994_s15, %s799_s29 }
  0x1f   : > { %v451_v17 = vsel %vm450_vm4, %v446_v14, %v448_v15  ;;  %433 = vst.msk [vmem:[#allocation2] sm:$0xff] %vm432_vm8, %v431_v18  ;;  %p802_p2 = scmp.lt.s32.totalorder %s800_s7, %s794_s27 }
  0x20   : > { %v456_v19 = vsel %vm454_vm7, %v451_v17, 0.0  ;;  %p796_p13 = pnand %p795_p12, %p951_p4 }
  0x21   : > { %458 = vrot.lane.b32.xlu0 %v456_v19, %s879_s8  ;;  %p803_p3 = por %p802_p2, %p801_p1 }
  0x22   : > { %p797_p0 = pneg %p796_p13 }
  0x24   : > { %p804_p5 = pnand %p803_p3, %p797_p0 }
  0x8e   : > { %v441_v20 = vpop.permute.xlu0 %440 }
  0x8f   : > { %444 = vst.msk [vmem:[#allocation2] sm:$0xff] %vm443_vm9, %v441_v20 }
  0x93   : > { %v459_v21 = vpop.permute.xlu0 %458 }
  0x94   : > { %462 = vst.msk [vmem:[#allocation2] sm:$0xff] %vm461_vm10, %v459_v21 }
  0x9b   : > { %v463_v22 = vld [vmem:[#allocation2] sm:$0xff] }
  0x9c   : > { %727 = vmatmul.mubr.msk.f32.vlgmr.msra.gmra.mrb[0].mxu0 %vm473_vm11, %v463_v22 }
 0x16f   : > { %v547_v24 = vpop.f32.mrb[0].mxu0 }
 0x170   : > { %v548_v25 = vadd.f32 %v712_v23, %v547_v24  ;;  %v728_v26 = vpop.f32.mrb[1].mxu0 }
 0x172   : > { %v551_v27 = vmax.f32 %v548_v25, 0.0 }
 0x174   : > { %552 = vst [vmem:[%s362_s14] sm:$0xff] %v551_v27 }
 0x175   : > { %807 = shalt.err (!%p804_p5)
}
 0x176   : > { %s808_s8 = scalar_lea.hbm %s992_s24, 128  ;;  %s812_s11 = scalar_lea.hbm %s1044_s5, 256 }
 0x177   : > { %p809_p6 = scmp.ne.s32.totalorder %s992_s24, %s808_s8  ;;  %p813_p10 = scmp.lt.u32.totalorder %s992_s24, %s1044_s5 }
 0x178   : > { %p814_p11 = scmp.lt.u32.totalorder %s812_s11, %s808_s8  ;;  %p816_p13 = scmp.lt.u32.totalorder %s808_s8, %s992_s24 }
 0x179   : > { %p810_p7 = pnand %p809_p6, %p951_p4 }
 0x17a   : > { %p815_p12 = por %p814_p11, %p813_p10 }
 0x17b   : > { %p811_p9 = pneg %p810_p7 }
 0x17c   : > { %p817_p0 = por %p816_p13, %p815_p12 }
 0x17e   : > { %p818_p1 = pnand %p817_p0, %p811_p9 }
 0x180   : > { %821 = shalt.err (!%p818_p1)
}
 0x181   : > { %733 = dma.vmem_to_hbm [thread:$0]  (%p951_p4), %s994_s15, 128, %s992_s24, %s554_s25  }
 0x182 PF: > { %p739_p2 = scmp.ge.s32.totalorder %s872_s23, 2  ;;  %s581_s14 = sand.u32 1, %s852_s18  }
 0x183   : > { %s582_s16 = scalar_lea.sflag [#allocation4], %s581_s14 }
 0x184   : > { %p736_p3 = pnand %p739_p2, %p958_p8 }
 0x186   : > { %847 = dma.done.wait (!%p736_p3), %s582_s16, 128  }
 0x187   : > { %849 = vsyncadd (!%p736_p3), %s582_s16, 4294967168  ;;  %s18_s23 = sadd.s32 1, %s872_s23   ;;  %s1047_s18 = smov %s856_s19 }
 0x188   : > { %p15_p5 = scmp.ge.s32.totalorder %s18_s23, 4   ;;  %s1048_s19 = smov %s860_s20 }
 0x189   : > { %s1049_s20 = smov %s964_s6  ;;  %s1050_s21 = smov %s868_s22 }
 0x18a   : > { %s1051_s22 = smov %s1053_s26  ;;  %17 = sbr.rel (!%p15_p5) target bundleno = 4 (0x4), region = 91 }
 0x191   :  { %587 = vsyncpa [#allocation4], 1 }
 0x192   :  { %589 = vsyncpa [#allocation4 + $0x1], 1 }

</bundles_post_ra>
